<compile_context>
chip_gen: v7x
topology: tpu7x:2x2x1
jax: 0.10.0
libtpu: 0.0.40
codegen_flags: <defaults>
</compile_context>

<pallas_src>
import math
from functools import partial

import jax
import jax.numpy as jnp
from jax.experimental import pallas as pl
from jax.experimental.pallas import tpu as pltpu


def _round_up(x, m):
    return ((x + m - 1) // m) * m


def _style_heads_kernel(idx_ref, w1_ref, w234_ref, b_ref, o_ref, *,
                        heads_per_step, scale1, scale2, neg_slope,
                        compute_dtype):
    """One grid step = `heads_per_step` full 4-layer MLP heads.

    idx_ref : (B_pad, 1)            int32   class indices (resident, same every step)
    w1_ref  : (hps, K_pad, D)       bf16    layer-0 weights (class dim zero-padded)
    w234_ref: (hps, 3, D, D)        bf16    layer-1..3 weights
    b_ref   : (hps, 4, D)           f32     biases for the 4 layers
    o_ref   : (hps, B_pad, D)       f32     per-head outputs (lane-dense, D=128)
    """
    b_pad = idx_ref.shape[0]
    k_pad = w1_ref.shape[1]

    # Fused one-hot: (B_pad, K_pad) built in-register from the class indices.
    lane = jax.lax.broadcasted_iota(jnp.int32, (b_pad, k_pad), 1)
    onehot = (lane == idx_ref[...]).astype(compute_dtype)

    for h in range(heads_per_step):
        bvec = b_ref[h]  # (4, D) f32

        # layer 0: one_hot @ (W1 * scale1) + b1 ; LeakyReLU(0.2)
        a = jnp.dot(onehot, w1_ref[h], preferred_element_type=jnp.float32)
        a = a * scale1 + bvec[0][None, :]
        a = jnp.where(a > 0, a, neg_slope * a)

        # layers 1..3
        for l in range(3):
            a = jnp.dot(a.astype(compute_dtype), w234_ref[h, l],
                        preferred_element_type=jnp.float32)
            a = a * scale2 + bvec[l + 1][None, :]
            a = jnp.where(a > 0, a, neg_slope * a)

        o_ref[h] = a.astype(o_ref.dtype)


def style_extractor_forward(x, params, *, class_n=108, style_n=16,
                            style_dim=128, heads_per_step=2,
                            compute_dtype=jnp.bfloat16):
    """Matches StyleExtractor.forward: one_hot -> 16 x (EqualLinear+LeakyReLU)x4
    -> stack heads -> reshape (B, style_dim, 4, 4)."""
    assert style_n == 16, "reshape to (., style_dim, 4, 4) assumes style_n == 16"
    assert style_dim % 128 == 0
    assert style_n % heads_per_step == 0

    w1, w234, b_all = params  # (S, class_n, D), (S, 3, D, D), (S, 4, D)
    D = style_dim

    idx = jnp.asarray(x).reshape(-1).astype(jnp.int32)   # torch: x.long().squeeze(1)
    B = idx.shape[0]
    B_pad = _round_up(max(B, 8), 8)
    K_pad = _round_up(class_n, 128)

    # One-time parameter packing: pad contraction dim to lane width, cast bf16.
    w1_p = jnp.pad(w1, ((0, 0), (0, K_pad - class_n), (0, 0))).astype(compute_dtype)
    w234_p = w234.astype(compute_dtype)
    b_p = b_all.astype(jnp.float32)
    idx_p = jnp.pad(idx, (0, B_pad - B)).reshape(B_pad, 1)

    scale1 = 1.0 / math.sqrt(class_n)   # EqualLinear scale uses true in_features
    scale2 = 1.0 / math.sqrt(D)

    hps = heads_per_step
    kernel = partial(_style_heads_kernel, heads_per_step=hps, scale1=scale1,
                     scale2=scale2, neg_slope=0.2, compute_dtype=compute_dtype)

    itemsize = jnp.dtype(compute_dtype).itemsize
    flops = 2 * style_n * B_pad * D * (K_pad + 3 * D)
    bytes_accessed = (style_n * K_pad * D * itemsize          # w1
                      + style_n * 3 * D * D * itemsize        # w234
                      + style_n * 4 * D * 4                   # bias
                      + B_pad * 4                             # indices
                      + style_n * B_pad * D * 4)              # output

    out = pl.pallas_call(
        kernel,
        out_shape=jax.ShapeDtypeStruct((style_n, B_pad, D), jnp.float32),
        grid_spec=pltpu.PrefetchScalarGridSpec(
            num_scalar_prefetch=0,
            grid=(style_n // hps,),
            in_specs=[
                pl.BlockSpec((B_pad, 1), lambda i: (0, 0)),         # indices (resident)
                pl.BlockSpec((hps, K_pad, D), lambda i: (i, 0, 0)),  # layer-0 weights
                pl.BlockSpec((hps, 3, D, D), lambda i: (i, 0, 0, 0)),  # layer-1..3 weights
                pl.BlockSpec((hps, 4, D), lambda i: (i, 0, 0)),      # biases
            ],
            out_specs=pl.BlockSpec((hps, B_pad, D), lambda i: (i, 0, 0)),
        ),
        compiler_params=pltpu.CompilerParams(
            dimension_semantics=("parallel",),
            vmem_limit_bytes=32 * 1024 * 1024,
        ),
        cost_estimate=pl.CostEstimate(flops=flops, transcendentals=0,
                                      bytes_accessed=bytes_accessed),
    )(idx_p, w1_p, w234_p, b_p)

    out = out[:, :B, :]                    # drop batch padding: (style_n, B, D)
    style = jnp.transpose(out, (1, 2, 0))  # (B, D, style_n) == torch.cat(dim=2)
    return style.reshape(B, D, 4, 4)


def init_style_extractor_params(key, style_n=16, class_n=108, style_dim=128):
    """Matches StyleExtractor.__init__: EqualLinear weights ~ N(0,1), zero bias."""
    keys = jax.random.split(key, style_n * 4)
    w1, w234 = [], []
    for i in range(style_n):
        k0, k1, k2, k3 = keys[4 * i:4 * i + 4]
        w1.append(jax.random.normal(k0, (class_n, style_dim), jnp.float32))
        w234.append(jnp.stack([
            jax.random.normal(k1, (style_dim, style_dim), jnp.float32),
            jax.random.normal(k2, (style_dim, style_dim), jnp.float32),
            jax.random.normal(k3, (style_dim, style_dim), jnp.float32),
        ]))
    w1 = jnp.stack(w1)                                    # (S, class_n, D)
    w234 = jnp.stack(w234)                                # (S, 3, D, D)
    b = jnp.zeros((style_n, 4, style_dim), jnp.float32)   # EqualLinear bias = zeros
    return w1, w234, b


def style_extractor_ref(x, params, *, class_n=108, style_n=16, style_dim=128):
    """Pure-JAX f32 reference with exact StyleExtractor semantics."""
    idx = jnp.asarray(x).reshape(-1)
    oh = jax.nn.one_hot(idx, class_n, dtype=jnp.float32)
    w1, w234, b = params
    s1 = 1.0 / math.sqrt(class_n)
    s2 = 1.0 / math.sqrt(style_dim)
    outs = []
    for i in range(style_n):
        h = oh @ (w1[i] * s1) + b[i, 0]
        h = jnp.where(h > 0, h, 0.2 * h)
        for l in range(3):
            h = h @ (w234[i, l] * s2) + b[i, l + 1]
            h = jnp.where(h > 0, h, 0.2 * h)
        outs.append(h[:, :, None])
    style = jnp.concatenate(outs, axis=2)                 # (B, D, style_n)
    return style.reshape(-1, style_dim, 4, 4)


if __name__ == "__main__":
    key = jax.random.PRNGKey(0)
    k_x, k_p = jax.random.split(key)

    B, style_n, class_n, style_dim = 2, 16, 108, 128
    x = jax.random.randint(k_x, (B, 1), 0, class_n)       # class ids, shape (B, 1)
    params = init_style_extractor_params(k_p, style_n, class_n, style_dim)

    fwd = jax.jit(partial(style_extractor_forward, class_n=class_n,
                          style_n=style_n, style_dim=style_dim))
    out = jax.block_until_ready(fwd(x, params))

    ref = style_extractor_ref(x, params, class_n=class_n, style_n=style_n,
                              style_dim=style_dim)

    assert out.shape == (B, style_dim, 4, 4), out.shape
    max_err = float(jnp.max(jnp.abs(out - ref)))
    # bf16 weights/activations with f32 accumulation: expect ~1e-3 abs error.
    assert jnp.allclose(out, ref, atol=2e-2, rtol=2e-2), max_err
    print("KERNEL_OK")
</pallas_src>

<mosaic_0001>
module attributes {stable_mosaic.version = 11 : i64} {
  func.func @_style_heads_kernel(%arg0: i32, %arg1: memref<8x1xi32, #tpu.memory_space<vmem>>, %arg2: memref<2x128x128xbf16, #tpu.memory_space<vmem>>, %arg3: memref<2x3x128x128xbf16, #tpu.memory_space<vmem>>, %arg4: memref<2x4x128xf32, #tpu.memory_space<vmem>>, %arg5: memref<2x8x128xf32, #tpu.memory_space<vmem>>) attributes {dimension_semantics = [#tpu.dimension_semantics<parallel>], iteration_bounds = array<i64: 8>, scalar_prefetch = 0 : i64, scratch_operands = 0 : i64, tpu.core_type = #tpu.core_type<tc>, window_params = [{pipeline_mode = #tpu.pipeline_mode<synchronous>, transform_indices = @transform_0, window_bounds = array<i64: 8, 1>}, {transform_indices = @transform_1, window_bounds = array<i64: 2, 128, 128>}, {transform_indices = @transform_2, window_bounds = array<i64: 2, 3, 128, 128>}, {transform_indices = @transform_3, window_bounds = array<i64: 2, 4, 128>}, {transform_indices = @transform_4, window_bounds = array<i64: 2, 8, 128>}]} {
    %0 = tpu.iota {dimensions = array<i32: 1>} : vector<8x128xi32>
    %c0 = arith.constant 0 : index
    %c0_0 = arith.constant 0 : index
    %1 = vector.load %arg1[%c0, %c0_0] : memref<8x1xi32, #tpu.memory_space<vmem>>, vector<8x1xi32>
    %2 = vector.broadcast %1 : vector<8x1xi32> to vector<8x128xi32>
    %3 = arith.cmpi eq, %0, %2 : vector<8x128xi32>
    %4 = arith.extui %3 : vector<8x128xi1> to vector<8x128xi32>
    %5 = arith.sitofp %4 : vector<8x128xi32> to vector<8x128xf32>
    %6 = arith.truncf %5 : vector<8x128xf32> to vector<8x128xbf16>
    %c0_1 = arith.constant 0 : index
    %c0_2 = arith.constant 0 : index
    %c0_3 = arith.constant 0 : index
    %7 = vector.load %arg4[%c0_1, %c0_2, %c0_3] : memref<2x4x128xf32, #tpu.memory_space<vmem>>, vector<1x4x128xf32>
    %8 = vector.shape_cast %7 : vector<1x4x128xf32> to vector<4x128xf32>
    %c0_4 = arith.constant 0 : index
    %c0_5 = arith.constant 0 : index
    %c0_6 = arith.constant 0 : index
    %9 = vector.load %arg2[%c0_4, %c0_5, %c0_6] : memref<2x128x128xbf16, #tpu.memory_space<vmem>>, vector<1x128x128xbf16>
    %10 = vector.shape_cast %9 : vector<1x128x128xbf16> to vector<128x128xbf16>
    %cst = arith.constant dense<0.000000e+00> : vector<8x128xf32>
    %11 = tpu.matmul %6, %10, %cst {dimension_numbers = #tpu.dot_dimension_numbers<[1], [0], [0], [1], [0, 0, 1, 1], [], []>} : vector<8x128xbf16>, vector<128x128xbf16>, vector<8x128xf32> -> vector<8x128xf32>
    %cst_7 = arith.constant 0.0962250456 : f32
    %12 = vector.broadcast %cst_7 : f32 to vector<8x128xf32>
    %13 = arith.mulf %11, %12 : vector<8x128xf32>
    %14 = vector.extract_strided_slice %8 {offsets = [0, 0], sizes = [1, 128], strides = [1, 1]} : vector<4x128xf32> to vector<1x128xf32>
    %15 = vector.shape_cast %14 : vector<1x128xf32> to vector<128xf32>
    %16 = vector.shape_cast %15 : vector<128xf32> to vector<1x128xf32>
    %17 = vector.broadcast %16 : vector<1x128xf32> to vector<8x128xf32>
    %18 = arith.addf %13, %17 : vector<8x128xf32>
    %cst_8 = arith.constant 0.000000e+00 : f32
    %19 = vector.broadcast %cst_8 : f32 to vector<8x128xf32>
    %20 = arith.cmpf ogt, %18, %19 : vector<8x128xf32>
    %cst_9 = arith.constant 2.000000e-01 : f32
    %21 = vector.broadcast %cst_9 : f32 to vector<8x128xf32>
    %22 = arith.mulf %21, %18 : vector<8x128xf32>
    %23 = arith.select %20, %18, %22 : vector<8x128xi1>, vector<8x128xf32>
    %24 = arith.truncf %23 : vector<8x128xf32> to vector<8x128xbf16>
    %c0_10 = arith.constant 0 : index
    %c0_11 = arith.constant 0 : index
    %c0_12 = arith.constant 0 : index
    %c0_13 = arith.constant 0 : index
    %25 = vector.load %arg3[%c0_10, %c0_11, %c0_12, %c0_13] : memref<2x3x128x128xbf16, #tpu.memory_space<vmem>>, vector<1x1x128x128xbf16>
    %26 = vector.shape_cast %25 : vector<1x1x128x128xbf16> to vector<128x128xbf16>
    %cst_14 = arith.constant dense<0.000000e+00> : vector<8x128xf32>
    %27 = tpu.matmul %24, %26, %cst_14 {dimension_numbers = #tpu.dot_dimension_numbers<[1], [0], [0], [1], [0, 0, 1, 1], [], []>} : vector<8x128xbf16>, vector<128x128xbf16>, vector<8x128xf32> -> vector<8x128xf32>
    %cst_15 = arith.constant 0.0883883461 : f32
    %28 = vector.broadcast %cst_15 : f32 to vector<8x128xf32>
    %29 = arith.mulf %27, %28 : vector<8x128xf32>
    %30 = vector.extract_strided_slice %8 {offsets = [1, 0], sizes = [1, 128], strides = [1, 1]} : vector<4x128xf32> to vector<1x128xf32>
    %31 = vector.shape_cast %30 : vector<1x128xf32> to vector<128xf32>
    %32 = vector.shape_cast %31 : vector<128xf32> to vector<1x128xf32>
    %33 = vector.broadcast %32 : vector<1x128xf32> to vector<8x128xf32>
    %34 = arith.addf %29, %33 : vector<8x128xf32>
    %cst_16 = arith.constant 0.000000e+00 : f32
    %35 = vector.broadcast %cst_16 : f32 to vector<8x128xf32>
    %36 = arith.cmpf ogt, %34, %35 : vector<8x128xf32>
    %cst_17 = arith.constant 2.000000e-01 : f32
    %37 = vector.broadcast %cst_17 : f32 to vector<8x128xf32>
    %38 = arith.mulf %37, %34 : vector<8x128xf32>
    %39 = arith.select %36, %34, %38 : vector<8x128xi1>, vector<8x128xf32>
    %40 = arith.truncf %39 : vector<8x128xf32> to vector<8x128xbf16>
    %c0_18 = arith.constant 0 : index
    %c1 = arith.constant 1 : index
    %c0_19 = arith.constant 0 : index
    %c0_20 = arith.constant 0 : index
    %41 = vector.load %arg3[%c0_18, %c1, %c0_19, %c0_20] : memref<2x3x128x128xbf16, #tpu.memory_space<vmem>>, vector<1x1x128x128xbf16>
    %42 = vector.shape_cast %41 : vector<1x1x128x128xbf16> to vector<128x128xbf16>
    %cst_21 = arith.constant dense<0.000000e+00> : vector<8x128xf32>
    %43 = tpu.matmul %40, %42, %cst_21 {dimension_numbers = #tpu.dot_dimension_numbers<[1], [0], [0], [1], [0, 0, 1, 1], [], []>} : vector<8x128xbf16>, vector<128x128xbf16>, vector<8x128xf32> -> vector<8x128xf32>
    %cst_22 = arith.constant 0.0883883461 : f32
    %44 = vector.broadcast %cst_22 : f32 to vector<8x128xf32>
    %45 = arith.mulf %43, %44 : vector<8x128xf32>
    %46 = vector.extract_strided_slice %8 {offsets = [2, 0], sizes = [1, 128], strides = [1, 1]} : vector<4x128xf32> to vector<1x128xf32>
    %47 = vector.shape_cast %46 : vector<1x128xf32> to vector<128xf32>
    %48 = vector.shape_cast %47 : vector<128xf32> to vector<1x128xf32>
    %49 = vector.broadcast %48 : vector<1x128xf32> to vector<8x128xf32>
    %50 = arith.addf %45, %49 : vector<8x128xf32>
    %cst_23 = arith.constant 0.000000e+00 : f32
    %51 = vector.broadcast %cst_23 : f32 to vector<8x128xf32>
    %52 = arith.cmpf ogt, %50, %51 : vector<8x128xf32>
    %cst_24 = arith.constant 2.000000e-01 : f32
    %53 = vector.broadcast %cst_24 : f32 to vector<8x128xf32>
    %54 = arith.mulf %53, %50 : vector<8x128xf32>
    %55 = arith.select %52, %50, %54 : vector<8x128xi1>, vector<8x128xf32>
    %56 = arith.truncf %55 : vector<8x128xf32> to vector<8x128xbf16>
    %c0_25 = arith.constant 0 : index
    %c2 = arith.constant 2 : index
    %c0_26 = arith.constant 0 : index
    %c0_27 = arith.constant 0 : index
    %57 = vector.load %arg3[%c0_25, %c2, %c0_26, %c0_27] : memref<2x3x128x128xbf16, #tpu.memory_space<vmem>>, vector<1x1x128x128xbf16>
    %58 = vector.shape_cast %57 : vector<1x1x128x128xbf16> to vector<128x128xbf16>
    %cst_28 = arith.constant dense<0.000000e+00> : vector<8x128xf32>
    %59 = tpu.matmul %56, %58, %cst_28 {dimension_numbers = #tpu.dot_dimension_numbers<[1], [0], [0], [1], [0, 0, 1, 1], [], []>} : vector<8x128xbf16>, vector<128x128xbf16>, vector<8x128xf32> -> vector<8x128xf32>
    %cst_29 = arith.constant 0.0883883461 : f32
    %60 = vector.broadcast %cst_29 : f32 to vector<8x128xf32>
    %61 = arith.mulf %59, %60 : vector<8x128xf32>
    %62 = vector.extract_strided_slice %8 {offsets = [3, 0], sizes = [1, 128], strides = [1, 1]} : vector<4x128xf32> to vector<1x128xf32>
    %63 = vector.shape_cast %62 : vector<1x128xf32> to vector<128xf32>
    %64 = vector.shape_cast %63 : vector<128xf32> to vector<1x128xf32>
    %65 = vector.broadcast %64 : vector<1x128xf32> to vector<8x128xf32>
    %66 = arith.addf %61, %65 : vector<8x128xf32>
    %cst_30 = arith.constant 0.000000e+00 : f32
    %67 = vector.broadcast %cst_30 : f32 to vector<8x128xf32>
    %68 = arith.cmpf ogt, %66, %67 : vector<8x128xf32>
    %cst_31 = arith.constant 2.000000e-01 : f32
    %69 = vector.broadcast %cst_31 : f32 to vector<8x128xf32>
    %70 = arith.mulf %69, %66 : vector<8x128xf32>
    %71 = arith.select %68, %66, %70 : vector<8x128xi1>, vector<8x128xf32>
    %c0_32 = arith.constant 0 : index
    %c0_33 = arith.constant 0 : index
    %c0_34 = arith.constant 0 : index
    %72 = vector.load %arg5[%c0_32, %c0_33, %c0_34] : memref<2x8x128xf32, #tpu.memory_space<vmem>>, vector<1x8x128xf32>
    %73 = vector.shape_cast %72 : vector<1x8x128xf32> to vector<8x128xf32>
    %74 = vector.shape_cast %71 : vector<8x128xf32> to vector<1x8x128xf32>
    tpu.vector_store %arg5[%c0_32, %c0_33, %c0_34], %74 {strides = array<i32>} : memref<2x8x128xf32, #tpu.memory_space<vmem>>, vector<1x8x128xf32>,
    %c1_35 = arith.constant 1 : index
    %c0_36 = arith.constant 0 : index
    %c0_37 = arith.constant 0 : index
    %75 = vector.load %arg4[%c1_35, %c0_36, %c0_37] : memref<2x4x128xf32, #tpu.memory_space<vmem>>, vector<1x4x128xf32>
    %76 = vector.shape_cast %75 : vector<1x4x128xf32> to vector<4x128xf32>
    %c1_38 = arith.constant 1 : index
    %c0_39 = arith.constant 0 : index
    %c0_40 = arith.constant 0 : index
    %77 = vector.load %arg2[%c1_38, %c0_39, %c0_40] : memref<2x128x128xbf16, #tpu.memory_space<vmem>>, vector<1x128x128xbf16>
    %78 = vector.shape_cast %77 : vector<1x128x128xbf16> to vector<128x128xbf16>
    %cst_41 = arith.constant dense<0.000000e+00> : vector<8x128xf32>
    %79 = tpu.matmul %6, %78, %cst_41 {dimension_numbers = #tpu.dot_dimension_numbers<[1], [0], [0], [1], [0, 0, 1, 1], [], []>} : vector<8x128xbf16>, vector<128x128xbf16>, vector<8x128xf32> -> vector<8x128xf32>
    %cst_42 = arith.constant 0.0962250456 : f32
    %80 = vector.broadcast %cst_42 : f32 to vector<8x128xf32>
    %81 = arith.mulf %79, %80 : vector<8x128xf32>
    %82 = vector.extract_strided_slice %76 {offsets = [0, 0], sizes = [1, 128], strides = [1, 1]} : vector<4x128xf32> to vector<1x128xf32>
    %83 = vector.shape_cast %82 : vector<1x128xf32> to vector<128xf32>
    %84 = vector.shape_cast %83 : vector<128xf32> to vector<1x128xf32>
    %85 = vector.broadcast %84 : vector<1x128xf32> to vector<8x128xf32>
    %86 = arith.addf %81, %85 : vector<8x128xf32>
    %cst_43 = arith.constant 0.000000e+00 : f32
    %87 = vector.broadcast %cst_43 : f32 to vector<8x128xf32>
    %88 = arith.cmpf ogt, %86, %87 : vector<8x128xf32>
    %cst_44 = arith.constant 2.000000e-01 : f32
    %89 = vector.broadcast %cst_44 : f32 to vector<8x128xf32>
    %90 = arith.mulf %89, %86 : vector<8x128xf32>
    %91 = arith.select %88, %86, %90 : vector<8x128xi1>, vector<8x128xf32>
    %92 = arith.truncf %91 : vector<8x128xf32> to vector<8x128xbf16>
    %c1_45 = arith.constant 1 : index
    %c0_46 = arith.constant 0 : index
    %c0_47 = arith.constant 0 : index
    %c0_48 = arith.constant 0 : index
    %93 = vector.load %arg3[%c1_45, %c0_46, %c0_47, %c0_48] : memref<2x3x128x128xbf16, #tpu.memory_space<vmem>>, vector<1x1x128x128xbf16>
    %94 = vector.shape_cast %93 : vector<1x1x128x128xbf16> to vector<128x128xbf16>
    %cst_49 = arith.constant dense<0.000000e+00> : vector<8x128xf32>
    %95 = tpu.matmul %92, %94, %cst_49 {dimension_numbers = #tpu.dot_dimension_numbers<[1], [0], [0], [1], [0, 0, 1, 1], [], []>} : vector<8x128xbf16>, vector<128x128xbf16>, vector<8x128xf32> -> vector<8x128xf32>
    %cst_50 = arith.constant 0.0883883461 : f32
    %96 = vector.broadcast %cst_50 : f32 to vector<8x128xf32>
    %97 = arith.mulf %95, %96 : vector<8x128xf32>
    %98 = vector.extract_strided_slice %76 {offsets = [1, 0], sizes = [1, 128], strides = [1, 1]} : vector<4x128xf32> to vector<1x128xf32>
    %99 = vector.shape_cast %98 : vector<1x128xf32> to vector<128xf32>
    %100 = vector.shape_cast %99 : vector<128xf32> to vector<1x128xf32>
    %101 = vector.broadcast %100 : vector<1x128xf32> to vector<8x128xf32>
    %102 = arith.addf %97, %101 : vector<8x128xf32>
    %cst_51 = arith.constant 0.000000e+00 : f32
    %103 = vector.broadcast %cst_51 : f32 to vector<8x128xf32>
    %104 = arith.cmpf ogt, %102, %103 : vector<8x128xf32>
    %cst_52 = arith.constant 2.000000e-01 : f32
    %105 = vector.broadcast %cst_52 : f32 to vector<8x128xf32>
    %106 = arith.mulf %105, %102 : vector<8x128xf32>
    %107 = arith.select %104, %102, %106 : vector<8x128xi1>, vector<8x128xf32>
    %108 = arith.truncf %107 : vector<8x128xf32> to vector<8x128xbf16>
    %c1_53 = arith.constant 1 : index
    %c1_54 = arith.constant 1 : index
    %c0_55 = arith.constant 0 : index
    %c0_56 = arith.constant 0 : index
    %109 = vector.load %arg3[%c1_53, %c1_54, %c0_55, %c0_56] : memref<2x3x128x128xbf16, #tpu.memory_space<vmem>>, vector<1x1x128x128xbf16>
    %110 = vector.shape_cast %109 : vector<1x1x128x128xbf16> to vector<128x128xbf16>
    %cst_57 = arith.constant dense<0.000000e+00> : vector<8x128xf32>
    %111 = tpu.matmul %108, %110, %cst_57 {dimension_numbers = #tpu.dot_dimension_numbers<[1], [0], [0], [1], [0, 0, 1, 1], [], []>} : vector<8x128xbf16>, vector<128x128xbf16>, vector<8x128xf32> -> vector<8x128xf32>
    %cst_58 = arith.constant 0.0883883461 : f32
    %112 = vector.broadcast %cst_58 : f32 to vector<8x128xf32>
    %113 = arith.mulf %111, %112 : vector<8x128xf32>
    %114 = vector.extract_strided_slice %76 {offsets = [2, 0], sizes = [1, 128], strides = [1, 1]} : vector<4x128xf32> to vector<1x128xf32>
    %115 = vector.shape_cast %114 : vector<1x128xf32> to vector<128xf32>
    %116 = vector.shape_cast %115 : vector<128xf32> to vector<1x128xf32>
    %117 = vector.broadcast %116 : vector<1x128xf32> to vector<8x128xf32>
    %118 = arith.addf %113, %117 : vector<8x128xf32>
    %cst_59 = arith.constant 0.000000e+00 : f32
    %119 = vector.broadcast %cst_59 : f32 to vector<8x128xf32>
    %120 = arith.cmpf ogt, %118, %119 : vector<8x128xf32>
    %cst_60 = arith.constant 2.000000e-01 : f32
    %121 = vector.broadcast %cst_60 : f32 to vector<8x128xf32>
    %122 = arith.mulf %121, %118 : vector<8x128xf32>
    %123 = arith.select %120, %118, %122 : vector<8x128xi1>, vector<8x128xf32>
    %124 = arith.truncf %123 : vector<8x128xf32> to vector<8x128xbf16>
    %c1_61 = arith.constant 1 : index
    %c2_62 = arith.constant 2 : index
    %c0_63 = arith.constant 0 : index
    %c0_64 = arith.constant 0 : index
    %125 = vector.load %arg3[%c1_61, %c2_62, %c0_63, %c0_64] : memref<2x3x128x128xbf16, #tpu.memory_space<vmem>>, vector<1x1x128x128xbf16>
    %126 = vector.shape_cast %125 : vector<1x1x128x128xbf16> to vector<128x128xbf16>
    %cst_65 = arith.constant dense<0.000000e+00> : vector<8x128xf32>
    %127 = tpu.matmul %124, %126, %cst_65 {dimension_numbers = #tpu.dot_dimension_numbers<[1], [0], [0], [1], [0, 0, 1, 1], [], []>} : vector<8x128xbf16>, vector<128x128xbf16>, vector<8x128xf32> -> vector<8x128xf32>
    %cst_66 = arith.constant 0.0883883461 : f32
    %128 = vector.broadcast %cst_66 : f32 to vector<8x128xf32>
    %129 = arith.mulf %127, %128 : vector<8x128xf32>
    %130 = vector.extract_strided_slice %76 {offsets = [3, 0], sizes = [1, 128], strides = [1, 1]} : vector<4x128xf32> to vector<1x128xf32>
    %131 = vector.shape_cast %130 : vector<1x128xf32> to vector<128xf32>
    %132 = vector.shape_cast %131 : vector<128xf32> to vector<1x128xf32>
    %133 = vector.broadcast %132 : vector<1x128xf32> to vector<8x128xf32>
    %134 = arith.addf %129, %133 : vector<8x128xf32>
    %cst_67 = arith.constant 0.000000e+00 : f32
    %135 = vector.broadcast %cst_67 : f32 to vector<8x128xf32>
    %136 = arith.cmpf ogt, %134, %135 : vector<8x128xf32>
    %cst_68 = arith.constant 2.000000e-01 : f32
    %137 = vector.broadcast %cst_68 : f32 to vector<8x128xf32>
    %138 = arith.mulf %137, %134 : vector<8x128xf32>
    %139 = arith.select %136, %134, %138 : vector<8x128xi1>, vector<8x128xf32>
    %c1_69 = arith.constant 1 : index
    %c0_70 = arith.constant 0 : index
    %c0_71 = arith.constant 0 : index
    %140 = vector.load %arg5[%c1_69, %c0_70, %c0_71] : memref<2x8x128xf32, #tpu.memory_space<vmem>>, vector<1x8x128xf32>
    %141 = vector.shape_cast %140 : vector<1x8x128xf32> to vector<8x128xf32>
    %142 = vector.shape_cast %139 : vector<8x128xf32> to vector<1x8x128xf32>
    tpu.vector_store %arg5[%c1_69, %c0_70, %c0_71], %142 {strides = array<i32>} : memref<2x8x128xf32, #tpu.memory_space<vmem>>, vector<1x8x128xf32>,
    return
  }
  func.func @transform_0(%arg0: i32) -> (i32, i32) {
    %c0_i32 = arith.constant 0 : i32
    %c0_i32_0 = arith.constant 0 : i32
    %c0_i32_1 = arith.constant 0 : i32
    return %c0_i32, %c0_i32_0 : i32, i32
  }
  func.func @transform_1(%arg0: i32) -> (i32, i32, i32) {
    %c0_i32 = arith.constant 0 : i32
    %c0_i32_0 = arith.constant 0 : i32
    %c0_i32_1 = arith.constant 0 : i32
    return %arg0, %c0_i32, %c0_i32_0 : i32, i32, i32
  }
  func.func @transform_2(%arg0: i32) -> (i32, i32, i32, i32) {
    %c0_i32 = arith.constant 0 : i32
    %c0_i32_0 = arith.constant 0 : i32
    %c0_i32_1 = arith.constant 0 : i32
    %c0_i32_2 = arith.constant 0 : i32
    return %arg0, %c0_i32, %c0_i32_0, %c0_i32_1 : i32, i32, i32, i32
  }
  func.func @transform_3(%arg0: i32) -> (i32, i32, i32) {
    %c0_i32 = arith.constant 0 : i32
    %c0_i32_0 = arith.constant 0 : i32
    %c0_i32_1 = arith.constant 0 : i32
    return %arg0, %c0_i32, %c0_i32_0 : i32, i32, i32
  }
  func.func @transform_4(%arg0: i32) -> (i32, i32, i32) {
    %c0_i32 = arith.constant 0 : i32
    %c0_i32_0 = arith.constant 0 : i32
    %c0_i32_1 = arith.constant 0 : i32
    return %arg0, %c0_i32, %c0_i32_0 : i32, i32, i32
  }
}

</mosaic_0001>

<bundles_post_ra>
// kernel: style_extractor_forward.1
= control target key start
LH: loop header
LB: loop body
LE: loop exit
PB: predicated region body
PF: predicated region fallthrough
CT: control target
= control target key end

     0   :  { %s1795_s15 = smov 0   ;;  %s2023_s0 = inlined_call_operand.vmem [shape: s32[8,1], index: 0, kind: input, shape index: {}]   ;;  %s2024_s1 = inlined_call_operand.vmem [shape: bf16[16,128,128], index: 1, kind: input, shape index: {}]   ;;  %s2025_s2 = inlined_call_operand.vmem [shape: bf16[16,3,128,128], index: 2, kind: input, shape index: {}]   ;;  %s2026_s3 = inlined_call_operand.vmem [shape: f32[16,4,128], index: 3, kind: input, shape index: {}]   ;;  %s2027_s4 = inlined_call_operand.vmem [shape: f32[16,8,128], index: 4, kind: output, shape index: {}]  }
   0x1 LB: > { %s1264_s16 = sadd.s32 4294967295, %s1764_s15   ;;  %p1268_p0 = scmp.ge.s32.totalorder %s1764_s15, 1  ;;  %s1764_s15 = sphi %s1795_s15, %s14_s15  }
   0x2   : > { %p187_p1 = scmp.lt.s32.totalorder %s1764_s15, 9 }
   0x4   : > { %p188_p2 = pnand %p1268_p0, %p187_p1 }
   0x5   : > { %v254_v0 = vld [vmem:[%s2023_s0] sm:$0xff] (!%p188_p2)  ;;  %s1269_s19 = sshll.u32 (!%p188_p2), %s1264_s16, 1  ;;  %v1766_v1 = vmov (!%p188_p2), 0   ;;  %v1767_v2 = vmov (!%p188_p2), 0.0   ;;  %vm1768_vm0 = vmmov (!%p188_p2), 0   ;;  %v252_v17 = vlaneseq (!%p188_p2) }
   0x6   : > { %191 = sbr.rel (%p188_p2) target bundleno = 1494 (0x5d6), region = 36  ;;  %1693 = vset.pattern.permute.xlu0 (!%p188_p2), %v1766_v1  ;;  %1520 = vmatprep.subr.bf16.mxu0 (!%p188_p2), %v1767_v2  ;;  %p226_p3 = scmp.lt.s32.totalorder (!%p188_p2), %s1269_s19, 15  ;;  %v1769_v21 = vmov (!%p188_p2), 1.0|1.0  }
   0x7   : > { %256 = vperm.xlu0 (!%p188_p2), %1693, %v254_v0   ;;  %1540 = vmatprep.subr.bf16.mxu1 (!%p188_p2), %v1767_v2  ;;  %v253_v18 = vand.u32 (!%p188_p2), 127, %v252_v17  ;;  %v1880_v30 = vshrl.u32 (!%p188_p2), %v252_v17, 7 }
   0x8   : > { %1536 = vmatprep.mubr.msk.bf16.mxu0 (!%p188_p2), %vm1768_vm0, %v1767_v2  ;;  %1556 = vmatprep.mubr.msk.bf16.mxu1 (!%p188_p2), %vm1768_vm0, %v1767_v2 }
   0x9   : > { %v370_v31 = vsub.s32 (!%p188_p2), 0, %v1880_v30  ;;  %v484_v51 = vsub.s32 (!%p188_p2), 1, %v1880_v30 }
   0xd   : > { %s2031_s19 = smov (!%p226_p3, %s1269_s19), 15 }
   0xe   : > { %s1447_s20 = sshll.u32 %s2031_s19, 6  ;;  %s1680_s24 = smul.u32 192, %s2031_s19 }
   0xf   : > { %s1818_s23 = scalar_lea.vmem %s2024_s1, %s1447_s20  ;;  %s1275_s28 = sshll.u32 %s2031_s19, 2 }
  0x10   : > { %v1694_v3 = vld [vmem:[%s1818_s23] sm:$0xff]   ;;  %v1695_v4 = vld [vmem:[%s1818_s23 + $0x8] sm:$0xff]   ;;  %s1827_s27 = scalar_lea.vmem %s2025_s2, %s1680_s24  ;;  %v1696_v5 = vld [vmem:[%s1818_s23 + $0x10] sm:$0xff]   ;;  %s1885_s5 = scalar_lea.vmem %s2026_s3, %s1275_s28 }
  0x11   : > { %1521 = vmatpush3.bf16.msra.mxu0 %v1694_v3  ;;  %v1702_v6 = vld [vmem:[%s1827_s27] sm:$0xff]   ;;  %v1697_v7 = vld [vmem:[%s1818_s23 + $0x18] sm:$0xff]   ;;  %v1703_v8 = vld [vmem:[%s1827_s27 + $0x8] sm:$0xff]   ;;  %s1277_s6 = sshll.u32 %s2031_s19, 3 }
  0x12   : > { %1522 = vmatprep.subr.bf16.mxu0 %v1767_v2  ;;  %1541 = vmatpush3.bf16.msra.mxu1 %v1702_v6  ;;  %v1698_v9 = vld [vmem:[%s1818_s23 + $0x20] sm:$0xff]   ;;  %v1704_v10 = vld [vmem:[%s1827_s27 + $0x10] sm:$0xff]   ;;  %v1699_v11 = vld [vmem:[%s1818_s23 + $0x28] sm:$0xff]   ;;  %s2006_s9 = scalar_lea.vmem %s2027_s4, %s1277_s6 }
  0x13   : > { %1542 = vmatprep.subr.bf16.mxu1 %v1767_v2  ;;  %v1705_v12 = vld [vmem:[%s1827_s27 + $0x18] sm:$0xff]   ;;  %v1700_v13 = vld [vmem:[%s1818_s23 + $0x30] sm:$0xff]   ;;  %v1706_v14 = vld [vmem:[%s1827_s27 + $0x20] sm:$0xff]  }
  0x14   : > { %v1701_v15 = vld [vmem:[%s1818_s23 + $0x38] sm:$0xff]   ;;  %v1707_v16 = vld [vmem:[%s1827_s27 + $0x28] sm:$0xff]   ;;  %v1708_v22 = vld [vmem:[%s1827_s27 + $0x30] sm:$0xff]  }
  0x15   : > { %1523 = vmatpush3.bf16.msra.mxu0 %v1695_v4  ;;  %v1709_v23 = vld [vmem:[%s1827_s27 + $0x38] sm:$0xff]   ;;  %v1710_v24 = vld [vmem:[%s1827_s27 + $0x40] sm:$0xff]   ;;  %v1711_v25 = vld [vmem:[%s1827_s27 + $0x48] sm:$0xff]  }
  0x16   : > { %1524 = vmatprep.subr.bf16.mxu0 %v1767_v2  ;;  %1543 = vmatpush3.bf16.msra.mxu1 %v1703_v8  ;;  %v1712_v26 = vld [vmem:[%s1827_s27 + $0x50] sm:$0xff]   ;;  %v1713_v27 = vld [vmem:[%s1827_s27 + $0x58] sm:$0xff]   ;;  %v1714_v28 = vld [vmem:[%s1827_s27 + $0x60] sm:$0xff]  }
  0x17   : > { %1544 = vmatprep.subr.bf16.mxu1 %v1767_v2  ;;  %v1715_v29 = vld [vmem:[%s1827_s27 + $0x68] sm:$0xff]   ;;  %v1889_v32 = vld [vmem:[%s1885_s5] sm:$0xf]  ;;  %v1716_v43 = vld [vmem:[%s1827_s27 + $0x70] sm:$0xff]  }
  0x18   : > { %v371_v33 = vrot.slane %v1889_v32, %v370_v31  ;;  %v1717_v44 = vld [vmem:[%s1827_s27 + $0x78] sm:$0xff]   ;;  %v1726_v45 = vld [vmem:[%s1827_s27 + $0x80] sm:$0xff]   ;;  %v1727_v46 = vld [vmem:[%s1827_s27 + $0x88] sm:$0xff]   ;;  %v485_v52 = vrot.slane %v1889_v32, %v484_v51 }
  0x19   : > { %1525 = vmatpush3.bf16.msra.mxu0 %v1696_v5  ;;  %v1728_v47 = vld [vmem:[%s1827_s27 + $0x90] sm:$0xff]   ;;  %v1729_v48 = vld [vmem:[%s1827_s27 + $0x98] sm:$0xff]   ;;  %v1730_v49 = vld [vmem:[%s1827_s27 + $0xa0] sm:$0xff]  }
  0x1a   : > { %1526 = vmatprep.subr.bf16.mxu0 %v1767_v2  ;;  %1545 = vmatpush3.bf16.msra.mxu1 %v1704_v10  ;;  %v1731_v50 = vld [vmem:[%s1827_s27 + $0xa8] sm:$0xff]   ;;  %v1718_v61 = vld [vmem:[%s1818_s23 + $0x40] sm:$0xff]   ;;  %v1720_v0 = vld [vmem:[%s1818_s23 + $0x50] sm:$0xff]  }
  0x1b   : > { %1546 = vmatprep.subr.bf16.mxu1 %v1767_v2  ;;  %v1719_v63 = vld [vmem:[%s1818_s23 + $0x48] sm:$0xff]   ;;  %v1721_v1 = vld [vmem:[%s1818_s23 + $0x58] sm:$0xff]   ;;  %v1722_v3 = vld [vmem:[%s1818_s23 + $0x60] sm:$0xff]  }
  0x1c   : > { %v1723_v4 = vld [vmem:[%s1818_s23 + $0x68] sm:$0xff]   ;;  %v1724_v5 = vld [vmem:[%s1818_s23 + $0x70] sm:$0xff]   ;;  %v1725_v6 = vld [vmem:[%s1818_s23 + $0x78] sm:$0xff]  }
  0x1d   : > { %1527 = vmatpush3.bf16.msra.mxu0 %v1697_v7  ;;  %v1732_v7 = vld [vmem:[%s1827_s27 + $0xb0] sm:$0xff]   ;;  %v1733_v8 = vld [vmem:[%s1827_s27 + $0xb8] sm:$0xff]  }
  0x1e   : > { %1528 = vmatprep.subr.bf16.mxu0 %v1767_v2  ;;  %1547 = vmatpush3.bf16.msra.mxu1 %v1705_v12 }
  0x1f   : > { %1548 = vmatprep.subr.bf16.mxu1 %v1767_v2 }
  0x21   : > { %1529 = vmatpush3.bf16.msra.mxu0 %v1698_v9  ;;  %v599_v9 = vsub.s32 2, %v1880_v30 }
  0x22   : > { %1530 = vmatprep.subr.bf16.mxu0 %v1767_v2  ;;  %1549 = vmatpush3.bf16.msra.mxu1 %v1706_v14 }
  0x23   : > { %1550 = vmatprep.subr.bf16.mxu1 %v1767_v2  ;;  %v600_v10 = vrot.slane %v1889_v32, %v599_v9 }
  0x25   : > { %1531 = vmatpush3.bf16.msra.mxu0 %v1699_v11 }
  0x26   : > { %1532 = vmatprep.subr.bf16.mxu0 %v1767_v2  ;;  %1551 = vmatpush3.bf16.msra.mxu1 %v1707_v16 }
  0x27   : > { %1552 = vmatprep.subr.bf16.mxu1 %v1767_v2 }
  0x29   : > { %1533 = vmatpush3.bf16.msra.mxu0 %v1700_v13 }
  0x2a   : > { %1534 = vmatprep.subr.bf16.mxu0 %v1767_v2  ;;  %1553 = vmatpush3.bf16.msra.mxu1 %v1708_v22  ;;  %v1736_v22 = vld [vmem:[%s1827_s27 + $0xd0] sm:$0xff]  }
  0x2b   : > { %1554 = vmatprep.subr.bf16.mxu1 %v1767_v2 }
  0x2d   : > { %1535 = vmatpush3.bf16.msra.mxu0 %v1701_v15 }
  0x2e   : > { %1560 = vmatprep.subr.bf16.mxu0 %v1767_v2  ;;  %1555 = vmatpush3.bf16.msra.mxu1 %v1709_v23  ;;  %v1737_v23 = vld [vmem:[%s1827_s27 + $0xd8] sm:$0xff]  }
  0x2f   : > { %1580 = vmatprep.subr.bf16.mxu1 %v1767_v2 }
  0x86   : > { %v257_v19 = vpop.permute.xlu0 %256 }
  0x87   : > { %vm258_vm1 = vcmp.eq.s32.totalorder %v253_v18, %v257_v19  ;;  %v1734_v19 = vld [vmem:[%s1827_s27 + $0xc0] sm:$0xff]  }
  0x88   : > { %vm1854_vm2 = vmpackc.low %vm258_vm1, %vm258_vm1 }
  0x89   : > { %1537 = vmatmul.mubr.msk.bf16.vlgmr.msra.gmra.mrb[0].mxu0 %vm1854_vm2, %v1769_v21 }
  0x8a   : > { %1576 = vmatprep.mubr.msk.bf16.mxu0 %vm1768_vm0, %v1767_v2  ;;  %1561 = vmatpush3.bf16.msra.mxu0 %v1710_v24  ;;  %v1738_v24 = vld [vmem:[%s1827_s27 + $0xe0] sm:$0xff]  }
  0x8b   : > { %1562 = vmatprep.subr.bf16.mxu0 %v1767_v2 }
  0x8e   : > { %1563 = vmatpush3.bf16.msra.mxu0 %v1711_v25  ;;  %v1739_v25 = vld [vmem:[%s1827_s27 + $0xe8] sm:$0xff]  }
  0x8f   : > { %1564 = vmatprep.subr.bf16.mxu0 %v1767_v2 }
  0x92   : > { %1565 = vmatpush3.bf16.msra.mxu0 %v1712_v26  ;;  %v1961_v26 = vld [vmem:[%s1885_s5 + $0x4] sm:$0xf] }
  0x93   : > { %1566 = vmatprep.subr.bf16.mxu0 %v1767_v2 }
  0x96   : > { %1567 = vmatpush3.bf16.msra.mxu0 %v1713_v27  ;;  %v832_v27 = vrot.slane %v1961_v26, %v370_v31 }
  0x97   : > { %1568 = vmatprep.subr.bf16.mxu0 %v1767_v2 }
  0x9a   : > { %1569 = vmatpush3.bf16.msra.mxu0 %v1714_v28  ;;  %v1740_v28 = vld [vmem:[%s1827_s27 + $0xf0] sm:$0xff]  }
  0x9b   : > { %1570 = vmatprep.subr.bf16.mxu0 %v1767_v2 }
  0x9e   : > { %1571 = vmatpush3.bf16.msra.mxu0 %v1715_v29 }
  0x9f   : > { %1572 = vmatprep.subr.bf16.mxu0 %v1767_v2 }
  0xa2   : > { %1573 = vmatpush3.bf16.msra.mxu0 %v1716_v43  ;;  %v1744_v43 = vld [vmem:[%s1827_s27 + $0x110] sm:$0xff]  }
  0xa3   : > { %1574 = vmatprep.subr.bf16.mxu0 %v1767_v2 }
  0xa6   : > { %1575 = vmatpush3.bf16.msra.mxu0 %v1717_v44  ;;  %v1745_v44 = vld [vmem:[%s1827_s27 + $0x118] sm:$0xff]  }
  0xa7   : > { %1600 = vmatprep.subr.bf16.mxu0 %v1767_v2 }
 0x15c   : > { %v361_v34 = vpop.f32.mrb[0].mxu0 }
 0x15d   : > { %v367_v35 = vmul.f32 0.096225046, %v361_v34  ;;  %v1538_v36 = vpop.f32.mrb[1].mxu0 }
 0x15e   : > { %v364_v37 = vpop.f32.mrb[2].mxu0 }
 0x15f   : > { %v372_v38 = vadd.f32 %v371_v33, %v367_v35  ;;  %v1539_v39 = vpop.f32.mrb[3].mxu0 }
 0x161   : > { %v374_v40 = vmul.f32 0.2, %v372_v38  ;;  %vm373_vm3 = vcmp.gt.f32.partialorder %v372_v38, 0.0 }
 0x163   : > { %v375_v41 = vsel %vm373_vm3, %v372_v38, %v374_v40  ;;  %v1741_v38 = vld [vmem:[%s1827_s27 + $0xf8] sm:$0xff]  }
 0x164   : > { %v376_v42 = vpack.c.bf16 %v375_v41, %v375_v41  ;;  %v1742_v41 = vld [vmem:[%s1827_s27 + $0x100] sm:$0xff]  }
 0x166   : > { %1557 = vmatmul.mubr.bf16.vlgmr.msra.gmra.mrb[0].mxu1 %v376_v42  ;;  %v1743_v42 = vld [vmem:[%s1827_s27 + $0x108] sm:$0xff]  }
 0x167   : > { %1596 = vmatprep.mubr.msk.bf16.mxu1 %vm1768_vm0, %v1767_v2  ;;  %1581 = vmatpush3.bf16.msra.mxu1 %v1726_v45  ;;  %v1746_v45 = vld [vmem:[%s1827_s27 + $0x120] sm:$0xff]  }
 0x168   : > { %1582 = vmatprep.subr.bf16.mxu1 %v1767_v2 }
 0x16b   : > { %1583 = vmatpush3.bf16.msra.mxu1 %v1727_v46  ;;  %v1747_v46 = vld [vmem:[%s1827_s27 + $0x128] sm:$0xff]  }
 0x16c   : > { %1584 = vmatprep.subr.bf16.mxu1 %v1767_v2 }
 0x16f   : > { %1585 = vmatpush3.bf16.msra.mxu1 %v1728_v47  ;;  %v1748_v47 = vld [vmem:[%s1827_s27 + $0x130] sm:$0xff]  }
 0x170   : > { %1586 = vmatprep.subr.bf16.mxu1 %v1767_v2 }
 0x173   : > { %1587 = vmatpush3.bf16.msra.mxu1 %v1729_v48  ;;  %v1749_v48 = vld [vmem:[%s1827_s27 + $0x138] sm:$0xff]  }
 0x174   : > { %1588 = vmatprep.subr.bf16.mxu1 %v1767_v2 }
 0x177   : > { %1589 = vmatpush3.bf16.msra.mxu1 %v1730_v49  ;;  %v1750_v49 = vld [vmem:[%s1827_s27 + $0x140] sm:$0xff]  }
 0x178   : > { %1590 = vmatprep.subr.bf16.mxu1 %v1767_v2 }
 0x17b   : > { %1591 = vmatpush3.bf16.msra.mxu1 %v1731_v50  ;;  %v1751_v50 = vld [vmem:[%s1827_s27 + $0x148] sm:$0xff]  }
 0x17c   : > { %1592 = vmatprep.subr.bf16.mxu1 %v1767_v2 }
 0x17f   : > { %1593 = vmatpush3.bf16.msra.mxu1 %v1732_v7 }
 0x180   : > { %1594 = vmatprep.subr.bf16.mxu1 %v1767_v2 }
 0x183   : > { %1595 = vmatpush3.bf16.msra.mxu1 %v1733_v8 }
 0x184   : > { %1620 = vmatprep.subr.bf16.mxu1 %v1767_v2 }
 0x239   : > { %v475_v53 = vpop.f32.mrb[0].mxu1 }
 0x23a   : > { %v481_v54 = vmul.f32 0.088388346, %v475_v53  ;;  %v1558_v55 = vpop.f32.mrb[1].mxu1  ;;  %v1753_v53 = vld [vmem:[%s1827_s27 + $0x158] sm:$0xff]  }
 0x23b   : > { %v478_v56 = vpop.f32.mrb[2].mxu1  ;;  %v1755_v55 = vld [vmem:[%s1827_s27 + $0x168] sm:$0xff]  }
 0x23c   : > { %v486_v57 = vadd.f32 %v485_v52, %v481_v54  ;;  %v1559_v58 = vpop.f32.mrb[3].mxu1  ;;  %v1752_v52 = vld [vmem:[%s1827_s27 + $0x150] sm:$0xff]   ;;  %v1754_v54 = vld [vmem:[%s1827_s27 + $0x160] sm:$0xff]   ;;  %v714_v56 = vsub.s32 3, %v1880_v30 }
 0x23e   : > { %vm487_vm4 = vcmp.gt.f32.partialorder %v486_v57, 0.0  ;;  %v488_v59 = vmul.f32 0.2, %v486_v57 }
 0x240   : > { %v489_v60 = vsel %vm487_vm4, %v486_v57, %v488_v59  ;;  %v715_v57 = vrot.slane %v1889_v32, %v714_v56  ;;  %v947_v32 = vrot.slane %v1961_v26, %v484_v51  ;;  %v1062_v51 = vrot.slane %v1961_v26, %v599_v9 }
 0x241   : > { %v490_v62 = vpack.c.bf16 %v489_v60, %v489_v60 }
 0x243   : > { %1577 = vmatmul.mubr.bf16.vlgmr.msra.gmra.mrb[4].mxu0 %v490_v62 }
 0x244   : > { %1601 = vmatpush3.bf16.msra.mxu0 %v1718_v61  ;;  %1616 = vmatprep.mubr.msk.bf16.mxu0 %vm1768_vm0, %v1767_v2 }
 0x245   : > { %1602 = vmatprep.subr.bf16.mxu0 %v1767_v2 }
 0x248   : > { %1603 = vmatpush3.bf16.msra.mxu0 %v1719_v63 }
 0x249   : > { %1604 = vmatprep.subr.bf16.mxu0 %v1767_v2 }
 0x24c   : > { %1605 = vmatpush3.bf16.msra.mxu0 %v1720_v0 }
 0x24d   : > { %1606 = vmatprep.subr.bf16.mxu0 %v1767_v2 }
 0x250   : > { %1607 = vmatpush3.bf16.msra.mxu0 %v1721_v1 }
 0x251   : > { %1608 = vmatprep.subr.bf16.mxu0 %v1767_v2 }
 0x254   : > { %1609 = vmatpush3.bf16.msra.mxu0 %v1722_v3 }
 0x255   : > { %1610 = vmatprep.subr.bf16.mxu0 %v1767_v2 }
 0x258   : > { %1611 = vmatpush3.bf16.msra.mxu0 %v1723_v4 }
 0x259   : > { %1612 = vmatprep.subr.bf16.mxu0 %v1767_v2 }
 0x25c   : > { %1613 = vmatpush3.bf16.msra.mxu0 %v1724_v5 }
 0x25d   : > { %1614 = vmatprep.subr.bf16.mxu0 %v1767_v2 }
 0x260   : > { %1615 = vmatpush3.bf16.msra.mxu0 %v1725_v6 }
 0x261   : > { %1640 = vmatprep.subr.bf16.mxu0 %v1767_v2 }
 0x263   : > { %1617 = vmatmul.mubr.msk.bf16.vlgmr.msra.gmra.mrb[8].mxu0 %vm1854_vm2, %v1769_v21  ;;  %v1735_v21 = vld [vmem:[%s1827_s27 + $0xc8] sm:$0xff]  }
 0x264   : > { %1656 = vmatprep.mubr.msk.bf16.mxu0 %vm1768_vm0, %v1767_v2  ;;  %1641 = vmatpush3.bf16.msra.mxu0 %v1742_v41 }
 0x265   : > { %1642 = vmatprep.subr.bf16.mxu0 %v1767_v2 }
 0x268   : > { %1643 = vmatpush3.bf16.msra.mxu0 %v1743_v42 }
 0x269   : > { %1644 = vmatprep.subr.bf16.mxu0 %v1767_v2 }
 0x26c   : > { %1645 = vmatpush3.bf16.msra.mxu0 %v1744_v43 }
 0x26d   : > { %1646 = vmatprep.subr.bf16.mxu0 %v1767_v2 }
 0x270   : > { %1647 = vmatpush3.bf16.msra.mxu0 %v1745_v44 }
 0x271   : > { %1648 = vmatprep.subr.bf16.mxu0 %v1767_v2 }
 0x274   : > { %1649 = vmatpush3.bf16.msra.mxu0 %v1746_v45 }
 0x275   : > { %1650 = vmatprep.subr.bf16.mxu0 %v1767_v2 }
 0x278   : > { %1651 = vmatpush3.bf16.msra.mxu0 %v1747_v46 }
 0x279   : > { %1652 = vmatprep.subr.bf16.mxu0 %v1767_v2 }
 0x27c   : > { %1653 = vmatpush3.bf16.msra.mxu0 %v1748_v47 }
 0x27d   : > { %1654 = vmatprep.subr.bf16.mxu0 %v1767_v2 }
 0x280   : > { %1655 = vmatpush3.bf16.msra.mxu0 %v1749_v48 }
 0x316   : > { %v590_v11 = vpop.f32.mrb[4].mxu0 }
 0x317   : > { %v596_v12 = vmul.f32 0.088388346, %v590_v11  ;;  %v1578_v13 = vpop.f32.mrb[5].mxu0 }
 0x318   : > { %v593_v14 = vpop.f32.mrb[6].mxu0  ;;  %v1756_v13 = vld [vmem:[%s1827_s27 + $0x170] sm:$0xff]  }
 0x319   : > { %v601_v15 = vadd.f32 %v600_v10, %v596_v12  ;;  %v1579_v16 = vpop.f32.mrb[7].mxu0  ;;  %v1757_v14 = vld [vmem:[%s1827_s27 + $0x178] sm:$0xff]  }
 0x31b   : > { %vm602_vm5 = vcmp.gt.f32.partialorder %v601_v15, 0.0  ;;  %v603_v17 = vmul.f32 0.2, %v601_v15 }
 0x31d   : > { %v604_v18 = vsel %vm602_vm5, %v601_v15, %v603_v17 }
 0x31e   : > { %v605_v20 = vpack.c.bf16 %v604_v18, %v604_v18 }
 0x320   : > { %1597 = vmatmul.mubr.bf16.vlgmr.msra.gmra.mrb[4].mxu1 %v605_v20 }
 0x321   : > { %1621 = vmatpush3.bf16.msra.mxu1 %v1734_v19  ;;  %1636 = vmatprep.mubr.msk.bf16.mxu1 %vm1768_vm0, %v1767_v2 }
 0x322   : > { %1622 = vmatprep.subr.bf16.mxu1 %v1767_v2 }
 0x325   : > { %1623 = vmatpush3.bf16.msra.mxu1 %v1735_v21 }
 0x326   : > { %1624 = vmatprep.subr.bf16.mxu1 %v1767_v2 }
 0x329   : > { %1625 = vmatpush3.bf16.msra.mxu1 %v1736_v22 }
 0x32a   : > { %1626 = vmatprep.subr.bf16.mxu1 %v1767_v2 }
 0x32d   : > { %1627 = vmatpush3.bf16.msra.mxu1 %v1737_v23 }
 0x32e   : > { %1628 = vmatprep.subr.bf16.mxu1 %v1767_v2 }
 0x331   : > { %1629 = vmatpush3.bf16.msra.mxu1 %v1738_v24 }
 0x332   : > { %1630 = vmatprep.subr.bf16.mxu1 %v1767_v2 }
 0x335   : > { %1631 = vmatpush3.bf16.msra.mxu1 %v1739_v25 }
 0x336   : > { %v822_v29 = vpop.f32.mrb[8].mxu0  ;;  %1632 = vmatprep.subr.bf16.mxu1 %v1767_v2 }
 0x337   : > { %v828_v33 = vmul.f32 0.096225046, %v822_v29  ;;  %v1618_v34 = vpop.f32.mrb[9].mxu0 }
 0x338   : > { %v825_v35 = vpop.f32.mrb[10].mxu0 }
 0x339   : > { %v833_v36 = vadd.f32 %v832_v27, %v828_v33  ;;  %v1619_v37 = vpop.f32.mrb[11].mxu0  ;;  %1633 = vmatpush3.bf16.msra.mxu1 %v1740_v28 }
 0x33a   : > { %1634 = vmatprep.subr.bf16.mxu1 %v1767_v2 }
 0x33b   : > { %vm834_vm6 = vcmp.gt.f32.partialorder %v833_v36, 0.0  ;;  %v835_v39 = vmul.f32 0.2, %v833_v36 }
 0x33d   : > { %v836_v31 = vsel %vm834_vm6, %v833_v36, %v835_v39  ;;  %1635 = vmatpush3.bf16.msra.mxu1 %v1741_v38 }
 0x33e   : > { %v837_v40 = vpack.c.bf16 %v836_v31, %v836_v31  ;;  %1660 = vmatprep.subr.bf16.mxu1 %v1767_v2 }
 0x340   : > { %1637 = vmatmul.mubr.bf16.vlgmr.msra.gmra.mrb[8].mxu1 %v837_v40 }
 0x341   : > { %1676 = vmatprep.mubr.msk.bf16.mxu1 %vm1768_vm0, %v1767_v2  ;;  %1661 = vmatpush3.bf16.msra.mxu1 %v1750_v49 }
 0x342   : > { %1662 = vmatprep.subr.bf16.mxu1 %v1767_v2 }
 0x345   : > { %1663 = vmatpush3.bf16.msra.mxu1 %v1751_v50 }
 0x346   : > { %1664 = vmatprep.subr.bf16.mxu1 %v1767_v2 }
 0x349   : > { %1665 = vmatpush3.bf16.msra.mxu1 %v1752_v52 }
 0x34a   : > { %1666 = vmatprep.subr.bf16.mxu1 %v1767_v2 }
 0x34d   : > { %1667 = vmatpush3.bf16.msra.mxu1 %v1753_v53 }
 0x34e   : > { %1668 = vmatprep.subr.bf16.mxu1 %v1767_v2 }
 0x351   : > { %1669 = vmatpush3.bf16.msra.mxu1 %v1754_v54 }
 0x352   : > { %1670 = vmatprep.subr.bf16.mxu1 %v1767_v2 }
 0x355   : > { %1671 = vmatpush3.bf16.msra.mxu1 %v1755_v55 }
 0x356   : > { %1672 = vmatprep.subr.bf16.mxu1 %v1767_v2 }
 0x359   : > { %1673 = vmatpush3.bf16.msra.mxu1 %v1756_v13 }
 0x35a   : > { %1674 = vmatprep.subr.bf16.mxu1 %v1767_v2  ;;  %v1177_v2 = vrot.slane %v1961_v26, %v714_v56 }
 0x35d   : > { %1675 = vmatpush3.bf16.msra.mxu1 %v1757_v14 }
 0x3f3   : > { %v705_v58 = vpop.f32.mrb[4].mxu1 }
 0x3f4   : > { %v711_v59 = vmul.f32 0.088388346, %v705_v58  ;;  %v1598_v60 = vpop.f32.mrb[5].mxu1 }
 0x3f5   : > { %v708_v61 = vpop.f32.mrb[6].mxu1 }
 0x3f6   : > { %v716_v62 = vadd.f32 %v715_v57, %v711_v59  ;;  %v1599_v63 = vpop.f32.mrb[7].mxu1 }
 0x3f8   : > { %vm717_vm7 = vcmp.gt.f32.partialorder %v716_v62, 0.0  ;;  %v718_v0 = vmul.f32 0.2, %v716_v62 }
 0x3fa   : > { %v719_v1 = vsel %vm717_vm7, %v716_v62, %v718_v0 }
 0x3fb   : > { %720 = vst [vmem:[%s2006_s9] sm:$0xff] %v719_v1 }
 0x413   : > { %v937_v3 = vpop.f32.mrb[8].mxu1 }
 0x414   : > { %v943_v4 = vmul.f32 0.088388346, %v937_v3  ;;  %v1638_v5 = vpop.f32.mrb[9].mxu1 }
 0x415   : > { %v940_v6 = vpop.f32.mrb[10].mxu1 }
 0x416   : > { %v948_v7 = vadd.f32 %v947_v32, %v943_v4  ;;  %v1639_v8 = vpop.f32.mrb[11].mxu1 }
 0x418   : > { %vm949_vm8 = vcmp.gt.f32.partialorder %v948_v7, 0.0  ;;  %v950_v10 = vmul.f32 0.2, %v948_v7 }
 0x41a   : > { %v951_v11 = vsel %vm949_vm8, %v948_v7, %v950_v10 }
 0x41b   : > { %v952_v12 = vpack.c.bf16 %v951_v11, %v951_v11 }
 0x41d   : > { %1657 = vmatmul.mubr.bf16.vlgmr.msra.gmra.mrb[12].mxu0 %v952_v12 }
 0x4f0   : > { %v1052_v15 = vpop.f32.mrb[12].mxu0 }
 0x4f1   : > { %v1058_v16 = vmul.f32 0.088388346, %v1052_v15  ;;  %v1658_v17 = vpop.f32.mrb[13].mxu0 }
 0x4f2   : > { %v1055_v18 = vpop.f32.mrb[14].mxu0 }
 0x4f3   : > { %v1063_v19 = vadd.f32 %v1062_v51, %v1058_v16  ;;  %v1659_v20 = vpop.f32.mrb[15].mxu0 }
 0x4f5   : > { %vm1064_vm9 = vcmp.gt.f32.partialorder %v1063_v19, 0.0  ;;  %v1065_v21 = vmul.f32 0.2, %v1063_v19 }
 0x4f7   : > { %v1066_v22 = vsel %vm1064_vm9, %v1063_v19, %v1065_v21 }
 0x4f8   : > { %v1067_v23 = vpack.c.bf16 %v1066_v22, %v1066_v22 }
 0x4fa   : > { %1677 = vmatmul.mubr.bf16.vlgmr.msra.gmra.mrb[12].mxu1 %v1067_v23 }
 0x5cd   : > { %v1167_v24 = vpop.f32.mrb[12].mxu1 }
 0x5ce   : > { %v1173_v25 = vmul.f32 0.088388346, %v1167_v24  ;;  %v1678_v27 = vpop.f32.mrb[13].mxu1 }
 0x5cf   : > { %v1170_v30 = vpop.f32.mrb[14].mxu1 }
 0x5d0   : > { %v1178_v28 = vadd.f32 %v1177_v2, %v1173_v25  ;;  %v1679_v9 = vpop.f32.mrb[15].mxu1 }
 0x5d2   : > { %vm1179_vm10 = vcmp.gt.f32.partialorder %v1178_v28, 0.0  ;;  %v1180_v29 = vmul.f32 0.2, %v1178_v28 }
 0x5d4   : > { %v1181_v33 = vsel %vm1179_vm10, %v1178_v28, %v1180_v29 }
 0x5d5   : > { %1444 = vst [vmem:[%s2006_s9 + $0x8] sm:$0xff] %v1181_v33 }
 0x5d6 PF: > { %s14_s15 = sadd.s32 1, %s1764_s15  }
 0x5d7   : > { %p11_p4 = scmp.ge.s32.totalorder %s14_s15, 10  }
 0x5d9   :  { %13 = sbr.rel (!%p11_p4) target bundleno = 1 (0x1), region = 80 }

</bundles_post_ra>
